<compile_context>
chip_gen: v5e
topology: v5e:2x2
jax: 0.10.0
libtpu: 0.0.40
codegen_flags: <defaults>
</compile_context>

<pallas_src>
import functools

import jax
import jax.numpy as jnp
from jax.experimental import pallas as pl
from jax.experimental.pallas import tpu as pltpu

MAT_DIFF_LOSS_SCALE = 0.001
_VPU_MAX_K = 7          # K <= this: unrolled VPU gram (3x3 input transform etc.)


# --------------------------------------------------------------------------- #
# NLL kernel (tiny: full pred/target resident, one reduce)                     #
# --------------------------------------------------------------------------- #
def _nll_kernel(pred_ref, target_ref, out_ref, *, inv_b):
    pred = pred_ref[...].astype(jnp.float32)               # (B, C) log-probs
    tgt = target_ref[...]                                   # (B, 1) i32
    b, c = pred.shape
    cls = jax.lax.broadcasted_iota(jnp.int32, (b, c), 1)
    picked = jnp.where(cls == tgt, pred, 0.0)                # select, no mul
    out_ref[0, 0] = -jnp.sum(picked) * jnp.float32(inv_b)


# --------------------------------------------------------------------------- #
# Regularizer kernel: streams batch tiles of every transform                   #
# --------------------------------------------------------------------------- #
def _reg_kernel(*refs, n_trans, ks, mxu_flags, bf16_flags, tile_b,
                tiles_per_par, batch, scale_over_b, needs_mask):
    trans_refs = refs[:n_trans]
    out_ref = refs[n_trans]
    acc_ref = refs[n_trans + 1]                              # (tile_b, 1) f32 VMEM

    p = pl.program_id(0)                                     # parallel (per-core)
    i = pl.program_id(1)                                     # arbitrary (reduction)
    last = pl.num_programs(1) - 1

    @pl.when(i == 0)
    def _():
        acc_ref[...] = jnp.zeros_like(acc_ref)

    fro_sum = jnp.zeros((tile_b, 1), jnp.float32)
    eye_cache = {}                                           # one mask per distinct K
    for t_ref, k, use_mxu, to_bf16 in zip(trans_refs, ks, mxu_flags, bf16_flags):
        a = t_ref[...]                                       # (tile_b, K, K)
        if use_mxu:
            # bf16 MXU gram (f32 accumulate); elementwise math stays f32.
            a_mm = a.astype(jnp.bfloat16) if to_bf16 else a
            gram = jnp.einsum('bij,bkj->bik', a_mm, a_mm,
                              preferred_element_type=jnp.float32)
            if k not in eye_cache:
                r = jax.lax.broadcasted_iota(jnp.int32, (k, k), 0)
                c = jax.lax.broadcasted_iota(jnp.int32, (k, k), 1)
                eye_cache[k] = (r == c).astype(jnp.float32)
            d = gram - eye_cache[k]                          # diagonal subtraction
            fro_sq = jnp.sum(jnp.sum(d * d, axis=-1), axis=-1, keepdims=True)
        else:
            # Small-K VPU path: unrolled upper-triangular gram, no MXU push.
            a32 = a.astype(jnp.float32)
            fro_sq = jnp.zeros((tile_b, 1), jnp.float32)
            for ii in range(k):
                for jj in range(ii, k):
                    g = jnp.sum(a32[:, ii, :] * a32[:, jj, :],
                                axis=-1, keepdims=True)      # (tile_b, 1)
                    if ii == jj:
                        fro_sq = fro_sq + (g - 1.0) * (g - 1.0)
                    else:
                        fro_sq = fro_sq + 2.0 * (g * g)
        fro_sum = fro_sum + jnp.sqrt(jnp.maximum(fro_sq, 0.0))

    if needs_mask:
        # Tail tile of a non-divisible batch: zero out rows past the real batch.
        rows = jax.lax.broadcasted_iota(jnp.int32, (tile_b, 1), 0)
        start = (p * tiles_per_par + i) * tile_b
        fro_sum = jnp.where(rows + start < batch, fro_sum, 0.0)

    acc_ref[...] = acc_ref[...] + fro_sum                    # VPU add; no per-step XLU

    @pl.when(i == last)
    def _():
        total = jnp.sum(acc_ref[...]) * jnp.float32(scale_over_b)
        out_ref[...] = jnp.broadcast_to(total, out_ref.shape).astype(jnp.float32)


# --------------------------------------------------------------------------- #
# Tiling / budget helpers                                                      #
# --------------------------------------------------------------------------- #
def _round_up(x, m):
    return ((x + m - 1) // m) * m


def _padded_kk_bytes(k, dtype):
    """Padded VMEM bytes of one (K, K) slab (sublane/lane round-up)."""
    itemsize = jnp.dtype(dtype).itemsize
    sublane = max(8, 32 // itemsize)          # 8 for f32, 16 for bf16
    return _round_up(k, sublane) * _round_up(k, 128) * itemsize


def _device_budgets():
    """(input+temp tile budget bytes, vmem_limit_bytes or None) per generation."""
    kind = ""
    try:
        kind = jax.devices()[0].device_kind.lower()
    except Exception:
        pass
    if "v7" in kind:                 # 64 MiB physical VMEM per core
        return 16 << 20, 40 << 20
    if "v2" in kind or "v3" in kind:
        return 4 << 20, None
    if "v5" in kind:                 # 128 MiB physical, 16 MiB scoped default
        return 8 << 20, 64 << 20
    return 20 << 20, 96 << 20        # v6e / v4 / default: 128 MiB physical


def _pick_tile_rows(batch, ks, dtypes, mxu_flags, budget_bytes, max_tile_rows=None):
    """Largest batch-tile whose padded, double-buffered inputs plus f32 gram
    temporaries fit the per-generation budget."""
    per_row = 0
    max_mxu_tmp = 0
    for k, dt, use_mxu in zip(ks, dtypes, mxu_flags):
        per_row += 2 * _padded_kk_bytes(k, dt)                   # double-buffered input
        if use_mxu:                                              # gram + residual (f32)
            max_mxu_tmp = max(max_mxu_tmp, 2 * _padded_kk_bytes(k, jnp.float32))
        else:                                                    # in-kernel f32 copy
            per_row += _padded_kk_bytes(k, jnp.float32)
    per_row += max_mxu_tmp
    cap = max(8, (budget_bytes // max(per_row, 1)) // 8 * 8)
    cap = min(cap, 1024)
    if max_tile_rows is not None:
        cap = min(cap, max_tile_rows)
    return max(1, min(cap, batch))


# --------------------------------------------------------------------------- #
# Public wrapper                                                               #
# --------------------------------------------------------------------------- #
def get_loss(pred, target, trans_feat_array=None,
             mat_diff_loss_scale=MAT_DIFF_LOSS_SCALE,
             max_tile_rows=None, use_bf16_mxu=True):
    """pred: [B, C] log-probs; target: [B] int class ids;
    trans_feat_array: optional list/tuple of [B, K, K] transforms (or None).
    Pass bf16 transforms to also halve the streamed HBM bytes."""
    B, C = pred.shape
    target2d = target.astype(jnp.int32).reshape(B, 1)
    vmem = pltpu.MemorySpace.VMEM
    smem = pltpu.MemorySpace.SMEM
    inv_b = 1.0 / float(B)

    # ---- NLL term (own tiny kernel; keeps the streamed kernel's VMEM free) ----
    nll = pl.pallas_call(
        functools.partial(_nll_kernel, inv_b=inv_b),
        out_shape=jax.ShapeDtypeStruct((1, 1), jnp.float32),
        in_specs=[pl.BlockSpec(memory_space=vmem),
                  pl.BlockSpec(memory_space=vmem)],
        out_specs=pl.BlockSpec(memory_space=smem),
        cost_estimate=pl.CostEstimate(flops=2 * B * C, transcendentals=0,
                                      bytes_accessed=B * C * 4 + B * 4 + 4),
    )(pred, target2d)[0, 0]

    if trans_feat_array is None or len(trans_feat_array) == 0:
        return nll

    # ---- feature-transform regularizer ----
    trans_list = list(trans_feat_array)          # N separate streamed arrays, no stack
    n = len(trans_list)
    Bt = int(trans_list[0].shape[0])
    assert all(int(t.shape[0]) == Bt for t in trans_list)
    ks = [int(t.shape[1]) for t in trans_list]
    dtypes = [t.dtype for t in trans_list]
    mxu_flags = [k > _VPU_MAX_K for k in ks]
    bf16_flags = [bool(use_bf16_mxu) and m and
                  jnp.dtype(dt) == jnp.dtype(jnp.float32)
                  for k, dt, m in zip(ks, dtypes, mxu_flags)]

    budget, vmem_limit = _device_budgets()
    tile_b = _pick_tile_rows(Bt, ks, dtypes, mxu_flags, budget, max_tile_rows)
    n_tiles = -(-Bt // tile_b)                                  # cdiv
    n_par = 2 if (n_tiles % 2 == 0 and n_tiles >= 2) else 1     # v7x dual-TC split
    tiles_per_par = n_tiles // n_par
    needs_mask = (n_tiles * tile_b != Bt)

    kernel = functools.partial(
        _reg_kernel, n_trans=n, ks=tuple(ks), mxu_flags=tuple(mxu_flags),
        bf16_flags=tuple(bf16_flags), tile_b=tile_b, tiles_per_par=tiles_per_par,
        batch=Bt, scale_over_b=float(mat_diff_loss_scale) / float(Bt),
        needs_mask=needs_mask)

    in_specs = [pl.BlockSpec((tile_b, k, k),
                             lambda p, i: (p * tiles_per_par + i, 0, 0))
                for k in ks]
    out_specs = pl.BlockSpec((1, 8, 128), lambda p, i: (p, 0, 0))

    grid_spec = pltpu.PrefetchScalarGridSpec(
        num_scalar_prefetch=0,
        grid=(n_par, tiles_per_par),
        in_specs=in_specs,
        out_specs=out_specs,
        scratch_shapes=[pltpu.VMEM((tile_b, 1), jnp.float32)])

    cp_kwargs = dict(dimension_semantics=("parallel", "arbitrary"))
    if vmem_limit is not None:
        cp_kwargs["vmem_limit_bytes"] = int(vmem_limit)

    flops = sum(2 * Bt * k ** 3 + 4 * Bt * k * k for k in ks)
    bytes_accessed = (sum(Bt * k * k * jnp.dtype(dt).itemsize
                          for k, dt in zip(ks, dtypes))
                      + n_par * 8 * 128 * 4)

    reg_parts = pl.pallas_call(
        kernel,
        out_shape=jax.ShapeDtypeStruct((n_par, 8, 128), jnp.float32),
        grid_spec=grid_spec,
        compiler_params=pltpu.CompilerParams(**cp_kwargs),
        cost_estimate=pl.CostEstimate(flops=int(flops), transcendentals=n * Bt,
                                      bytes_accessed=int(bytes_accessed)),
    )(*trans_list)

    # Per-core partial sums (already scaled by mat_diff_loss_scale / B).
    return nll + jnp.sum(reg_parts[:, 0, 0])


# --------------------------------------------------------------------------- #
# Reference + tests                                                            #
# --------------------------------------------------------------------------- #
def _reference(pred, target, trans_list, scale):
    B = pred.shape[0]
    nll = -jnp.mean(pred[jnp.arange(B), target])
    mat = 0.0
    for t in trans_list:
        K = t.shape[1]
        d = jnp.einsum('bij,bkj->bik', t, t) - jnp.eye(K)[None]
        mat = mat + jnp.mean(jnp.sqrt(jnp.sum(d * d, axis=(1, 2))))
    return nll + mat * scale


def _make_case(key, B, C, ks):
    k1, k2, k3 = jax.random.split(key, 3)
    logits = jax.random.normal(k1, (B, C), dtype=jnp.float32)
    pred = jax.nn.log_softmax(logits, axis=-1)
    target = jax.random.randint(k2, (B,), 0, C, dtype=jnp.int32)
    tkeys = jax.random.split(k3, len(ks))
    trans = [jax.random.normal(tk, (B, k, k), dtype=jnp.float32) * 0.1
             + jnp.eye(k)[None]
             for tk, k in zip(tkeys, ks)]
    return pred, target, trans


if __name__ == "__main__":
    key = jax.random.PRNGKey(0)
    k_a, k_b, k_c = jax.random.split(key, 3)

    # Case 1: single-tile, MXU (K=32, bf16 gram) + VPU (K=3) paths.
    pred, target, trans = _make_case(k_a, 8, 16, [32, 3])
    total = jax.block_until_ready(get_loss(pred, target, trans))
    ref = _reference(pred, target, trans, MAT_DIFF_LOSS_SCALE)
    assert jnp.allclose(total, ref, rtol=2e-3, atol=2e-3), (total, ref)

    # trans_feat_array == None branch (pure NLL).
    nll_only = jax.block_until_ready(get_loss(pred, target, None))
    nll_ref = -jnp.mean(pred[jnp.arange(8), target])
    assert jnp.allclose(nll_only, nll_ref, rtol=1e-5, atol=1e-5), (nll_only, nll_ref)

    # Case 2: non-divisible batch -> cdiv grid + masked tail tile.
    pred2, target2, trans2 = _make_case(k_b, 20, 16, [16, 3])
    total2 = jax.block_until_ready(get_loss(pred2, target2, trans2, max_tile_rows=8))
    ref2 = _reference(pred2, target2, trans2, MAT_DIFF_LOSS_SCALE)
    assert jnp.allclose(total2, ref2, rtol=2e-3, atol=2e-3), (total2, ref2)

    # Case 3: even tile count -> 2-way "parallel" split (dual TC on v7x).
    pred3, target3, trans3 = _make_case(k_c, 32, 16, [16, 3])
    total3 = jax.block_until_ready(get_loss(pred3, target3, trans3, max_tile_rows=8))
    ref3 = _reference(pred3, target3, trans3, MAT_DIFF_LOSS_SCALE)
    assert jnp.allclose(total3, ref3, rtol=2e-3, atol=2e-3), (total3, ref3)

    print("KERNEL_OK")
</pallas_src>

<mosaic_0001>
module attributes {stable_mosaic.version = 11 : i64} {
  func.func @_nll_kernel(%arg0: memref<8x16xf32, #tpu.memory_space<vmem>>, %arg1: memref<8x1xi32, #tpu.memory_space<vmem>>, %arg2: memref<1x1xf32, #tpu.memory_space<smem>>) attributes {dimension_semantics = [], scalar_prefetch = 0 : i64, scratch_operands = 0 : i64, tpu.core_type = #tpu.core_type<tc>} {
    %c0 = arith.constant 0 : index
    %c0_0 = arith.constant 0 : index
    %0 = vector.load %arg0[%c0, %c0_0] : memref<8x16xf32, #tpu.memory_space<vmem>>, vector<8x16xf32>
    %c0_1 = arith.constant 0 : index
    %c0_2 = arith.constant 0 : index
    %1 = vector.load %arg1[%c0_1, %c0_2] : memref<8x1xi32, #tpu.memory_space<vmem>>, vector<8x1xi32>
    %2 = tpu.iota {dimensions = array<i32: 1>} : vector<8x16xi32>
    %3 = vector.broadcast %1 : vector<8x1xi32> to vector<8x16xi32>
    %4 = arith.cmpi eq, %2, %3 : vector<8x16xi32>
    %cst = arith.constant 0.000000e+00 : f32
    %5 = vector.broadcast %cst : f32 to vector<8x16xf32>
    %6 = arith.select %4, %0, %5 : vector<8x16xi1>, vector<8x16xf32>
    %7 = vector.shape_cast %6 : vector<8x16xf32> to vector<1x8x16xf32>
    %cst_3 = arith.constant dense<0.000000e+00> : vector<1xf32>
    %8 = vector.multi_reduction <add>, %7, %cst_3 [1, 2] : vector<1x8x16xf32> to vector<1xf32>
    %9 = vector.shape_cast %8 : vector<1xf32> to vector<1x1x1xf32>
    %10 = vector.extract %9[0, 0, 0] : f32 from vector<1x1x1xf32>
    %cst_4 = arith.constant 0.000000e+00 : f32
    %11 = arith.subf %cst_4, %10 : f32
    %cst_5 = arith.constant 1.250000e-01 : f32
    %12 = arith.mulf %11, %cst_5 : f32
    %c0_6 = arith.constant 0 : index
    %c0_7 = arith.constant 0 : index
    %13 = memref.load %arg2[%c0_6, %c0_7] : memref<1x1xf32, #tpu.memory_space<smem>>
    memref.store %12, %arg2[%c0_6, %c0_7] : memref<1x1xf32, #tpu.memory_space<smem>>
    return
  }
}

</mosaic_0001>

<bundles_post_ra>
// kernel: tpu_custom_call.1
= control target key start
LH: loop header
LB: loop body
LE: loop exit
PB: predicated region body
PF: predicated region fallthrough
CT: control target
= control target key end

     0   :  { %s96_s0 = inlined_call_operand.vmem [shape: f32[8,16], index: 0, kind: input, shape index: {}]   ;;  %s97_s1 = inlined_call_operand.vmem [shape: s32[8,1], index: 1, kind: input, shape index: {}]   ;;  %s98_s2 = inlined_call_operand.hbm [shape: f32[1,1], index: 2, kind: output, shape index: {}]  }
   0x1   :  { %v13_v0 = vld [vmem:[%s97_s1] sm:$0xff] }
   0x2   :  { %7 = vsyncpa [#allocation3], 0  ;;  %v70_v1 = vmov 0   ;;  %v14_v2 = vlaneseq  ;;  %v12_v4 = vld [vmem:[%s96_s0] sm:$0xff]  ;;  %vm21_vm0 = vcmask 130048   ;;  %s41_s14 = sshll.u32 %s98_s2, 4  ;;  %s42_s14 = int_to_ptr.hbm [resolvable:$true] %s41_s14 }
   0x3   :  { %55 = vset.pattern.permute.xlu0 %v70_v1  ;;  %s71_s17 = smov [#allocation2]  }
   0x4   :  { %17 = vperm.xlu0 %55, %v13_v0   ;;  %v15_v3 = vand.u32 127, %v14_v2 }
  0x76   :  { %v18_v5 = vpop.permute.xlu0 %17 }
  0x77   :  { %vm19_vm1 = vcmp.eq.s32.totalorder %v15_v3, %v18_v5 }
  0x78   :  { %v20_v6 = vsel %vm19_vm1, %v12_v4, 0.0 }
  0x79   :  { %v22_v7 = vsel %vm21_vm0, %v20_v6, 0.0 }
  0x7a   :  { %23 = vadd.xlane.f32.xlu0 %v22_v7 }
  0xed   :  { %v24_v8 = vpop.xlane.xlu0 %23 }
  0xee   :  { %v25_v9 = vrot.slane %v24_v8, 4 }
  0xf0   :  { %v26_v10 = vadd.f32 %v25_v9, %v24_v8 }
  0xf2   :  { %v27_v11 = vrot.slane %v26_v10, 2 }
  0xf4   :  { %v28_v12 = vadd.f32 %v27_v11, %v26_v10 }
  0xf6   :  { %v29_v13 = vrot.slane %v28_v12, 1 }
  0xf8   :  { %v30_v14 = vadd.f32 %v29_v13, %v28_v12 }
  0xfa   :  { %51 = vpush %v30_v14 }
 0x12b   :  { %s52_s15 = spop %51 }
 0x12c   :  { %s32_s0 = ssub.f32 0.0, %s52_s15 }
 0x12e   :  { %s33_s16 = smul.f32 0.125, %s32_s0 }
 0x130   :  { %35 = sst [smem:[#allocation2]] %s33_s16 }
 0x131   :  { %44 = dma.smem_to_hbm %s71_s17, 16, %s42_s14, [#allocation3]  }
 0x132   :  { %68 = dma.done.wait [#allocation3], 16  }
 0x133   :  { %69 = vsyncadd [#allocation3], 4294967280 }
 0x134   :  { %49 = sfence }
 0x135   :  { %50 = vsyncpa [#allocation3], 1 }

</bundles_post_ra>
